<compile_context>
chip_gen: v7x
topology: tpu7x:2x2x1
jax: 0.10.0
libtpu: 0.0.40
codegen_flags: <defaults>
</compile_context>

<pallas_src>
import math

import jax
import jax.numpy as jnp
import numpy as np
from jax.experimental import pallas as pl
from jax.experimental.pallas import tpu as pltpu


SCALE = 1
KS = int(math.pow(2, SCALE))          # 2
NC = 3 * KS * KS                      # 12


def make_wavelet_weights():
    """Deterministic stand-in for dct['rec2']: 2x2 Haar filters, shape (12,1,2,2).

    Conv weight layout matches nn.Conv2d(groups=3): out channel g*4+k uses
    filter haar[k] on input channel g.
    """
    h = 0.5
    haar = np.array(
        [
            [[h, h], [h, h]],      # LL
            [[h, -h], [h, -h]],    # LH
            [[h, h], [-h, -h]],    # HL
            [[h, -h], [-h, h]],    # HH
        ],
        dtype=np.float32,
    )
    w = np.zeros((NC, 1, KS, KS), dtype=np.float32)
    for g in range(3):
        for k in range(4):
            w[g * 4 + k, 0] = haar[k]
    return jnp.asarray(w)


# ---------------------------------------------------------------------------
# Pallas kernel: fused grouped conv + channel shuffle on parity planes
# ---------------------------------------------------------------------------
def _wavelet_kernel(w_ref, x_ref, o_ref):
    """w_ref: SMEM (48,) f32, index = (g*4+k)*4 + dh*2 + dw
    x_ref: VMEM (3, 2, 2, th, tw)  parity planes x[b, g, 2h+dh, 2w+dw]
    o_ref: VMEM (12, th, tw)       band-major channels (k*3 + g)
    """
    for g in range(3):
        x00 = x_ref[g, 0, 0, :, :]
        x01 = x_ref[g, 0, 1, :, :]
        x10 = x_ref[g, 1, 0, :, :]
        x11 = x_ref[g, 1, 1, :, :]
        for k in range(4):
            base = (g * 4 + k) * 4
            acc = (w_ref[base + 0] * x00
                   + w_ref[base + 1] * x01
                   + w_ref[base + 2] * x10
                   + w_ref[base + 3] * x11)
            # transpose=True channel order baked in here (band-major).
            o_ref[k * 3 + g, :, :] = acc.astype(o_ref.dtype)


def _pick_tiles(Ho, Wo):
    """Lane-dense, large tiles that comfortably fit every TPU generation."""
    # Lane tile: full Wo when small, else a big multiple of 128.
    tw = Wo if Wo <= 1024 else 1024
    # Sublane tile: keep double-buffered (in + out) blocks around <= ~12 MiB:
    #   2 (dbl-buf) * 2 (in+out) * 12 * th * tw * 4 B  =>  th * tw <= 64K.
    th = min(Ho, max(1, 65536 // tw))
    if Ho >= 8:
        th = max(8, (th // 8) * 8)
    return th, tw


# ---------------------------------------------------------------------------
# Wrapper reproducing WaveletTransform.forward (dec=True, transpose=True)
# ---------------------------------------------------------------------------
def wavelet_transform(x, conv_w):
    """x: (B, 3, H, W) f32, conv_w: (12, 1, 2, 2) f32 -> (B, 12, H/2, W/2)."""
    B, C, H, W = x.shape
    assert C == 3 and H % KS == 0 and W % KS == 0
    Ho, Wo = H // KS, W // KS

    # Filter taps, flattened in (out_ch, dh, dw) order; pure jnp (jit safe).
    wflat = conv_w.reshape(-1).astype(jnp.float32)                  # (48,)

    # Single space-to-depth transform: (B,3,H,W) -> (B,3,2,2,Ho,Wo) parity planes.
    xp = jnp.transpose(x.reshape(B, 3, Ho, KS, Wo, KS), (0, 1, 3, 5, 2, 4))

    th, tw = _pick_tiles(Ho, Wo)
    grid = (B, pl.cdiv(Ho, th), pl.cdiv(Wo, tw))

    out = pl.pallas_call(
        _wavelet_kernel,
        out_shape=jax.ShapeDtypeStruct((B, NC, Ho, Wo), x.dtype),
        grid_spec=pltpu.PrefetchScalarGridSpec(
            num_scalar_prefetch=0,
            grid=grid,
            in_specs=[
                pl.BlockSpec(memory_space=pltpu.MemorySpace.SMEM),      # taps
                pl.BlockSpec((None, 3, KS, KS, th, tw),
                             lambda b, i, j: (b, 0, 0, 0, i, j)),       # planes
            ],
            out_specs=pl.BlockSpec((None, NC, th, tw),
                                   lambda b, i, j: (b, 0, i, j)),
        ),
        compiler_params=pltpu.CompilerParams(
            dimension_semantics=("parallel", "parallel", "parallel"),
            vmem_limit_bytes=32 * 1024 * 1024,
        ),
        cost_estimate=pl.CostEstimate(
            flops=7 * B * NC * Ho * Wo,
            transcendentals=0,
            bytes_accessed=4 * (B * 3 * H * W + B * NC * Ho * Wo) + 4 * 48,
        ),
    )(wflat, xp)
    return out


# ---------------------------------------------------------------------------
# Pure-JAX reference (grouped conv + channel shuffle), for a sanity check.
# ---------------------------------------------------------------------------
def wavelet_transform_ref(x, conv_w):
    out = jax.lax.conv_general_dilated(
        x, conv_w,
        window_strides=(KS, KS), padding="VALID",
        dimension_numbers=("NCHW", "OIHW", "NCHW"),
        feature_group_count=3,
    )                                                # (B, 12, Ho, Wo), group-major
    B, _, Ho, Wo = out.shape
    out = out.reshape(B, 3, 4, Ho, Wo)
    out = jnp.transpose(out, (0, 2, 1, 3, 4))        # band-major
    return out.reshape(B, NC, Ho, Wo)


if __name__ == "__main__":
    key = jax.random.PRNGKey(0)
    B, C, H, W = 2, 3, 16, 16
    x = jax.random.normal(key, (B, C, H, W), dtype=jnp.float32)

    conv_w = make_wavelet_weights()                  # (12, 1, 2, 2), deterministic

    out = jax.jit(wavelet_transform)(x, conv_w)
    out = jax.block_until_ready(out)

    ref = jax.block_until_ready(wavelet_transform_ref(x, conv_w))
    assert out.shape == (B, NC, H // KS, W // KS)
    np.testing.assert_allclose(np.asarray(out), np.asarray(ref), atol=1e-5, rtol=1e-5)

    print("KERNEL_OK")
</pallas_src>

<mosaic_0001>
module attributes {stable_mosaic.version = 11 : i64} {
  func.func @_wavelet_kernel(%arg0: i32, %arg1: i32, %arg2: i32, %arg3: memref<48xf32, #tpu.memory_space<smem>>, %arg4: memref<1x3x2x2x8x8xf32, #tpu.memory_space<vmem>>, %arg5: memref<1x12x8x8xf32, #tpu.memory_space<vmem>>) attributes {dimension_semantics = [#tpu.dimension_semantics<parallel>, #tpu.dimension_semantics<parallel>, #tpu.dimension_semantics<parallel>], iteration_bounds = array<i64: 2, 1, 1>, scalar_prefetch = 0 : i64, scratch_operands = 0 : i64, tpu.core_type = #tpu.core_type<tc>, window_params = [{transform_indices = @transform_0, window_bounds = array<i64: 48>}, {transform_indices = @transform_1, window_bounds = array<i64: 1, 3, 2, 2, 8, 8>}, {transform_indices = @transform_2, window_bounds = array<i64: 1, 12, 8, 8>}]} {
    %c0 = arith.constant 0 : index
    %c0_0 = arith.constant 0 : index
    %c0_1 = arith.constant 0 : index
    %c0_2 = arith.constant 0 : index
    %c0_3 = arith.constant 0 : index
    %c0_4 = arith.constant 0 : index
    %0 = vector.load %arg4[%c0, %c0_0, %c0_1, %c0_2, %c0_3, %c0_4] : memref<1x3x2x2x8x8xf32, #tpu.memory_space<vmem>>, vector<1x1x1x1x8x8xf32>
    %1 = vector.shape_cast %0 : vector<1x1x1x1x8x8xf32> to vector<8x8xf32>
    %c0_5 = arith.constant 0 : index
    %c0_6 = arith.constant 0 : index
    %c0_7 = arith.constant 0 : index
    %c1 = arith.constant 1 : index
    %c0_8 = arith.constant 0 : index
    %c0_9 = arith.constant 0 : index
    %2 = vector.load %arg4[%c0_5, %c0_6, %c0_7, %c1, %c0_8, %c0_9] : memref<1x3x2x2x8x8xf32, #tpu.memory_space<vmem>>, vector<1x1x1x1x8x8xf32>
    %3 = vector.shape_cast %2 : vector<1x1x1x1x8x8xf32> to vector<8x8xf32>
    %c0_10 = arith.constant 0 : index
    %c0_11 = arith.constant 0 : index
    %c1_12 = arith.constant 1 : index
    %c0_13 = arith.constant 0 : index
    %c0_14 = arith.constant 0 : index
    %c0_15 = arith.constant 0 : index
    %4 = vector.load %arg4[%c0_10, %c0_11, %c1_12, %c0_13, %c0_14, %c0_15] : memref<1x3x2x2x8x8xf32, #tpu.memory_space<vmem>>, vector<1x1x1x1x8x8xf32>
    %5 = vector.shape_cast %4 : vector<1x1x1x1x8x8xf32> to vector<8x8xf32>
    %c0_16 = arith.constant 0 : index
    %c0_17 = arith.constant 0 : index
    %c1_18 = arith.constant 1 : index
    %c1_19 = arith.constant 1 : index
    %c0_20 = arith.constant 0 : index
    %c0_21 = arith.constant 0 : index
    %6 = vector.load %arg4[%c0_16, %c0_17, %c1_18, %c1_19, %c0_20, %c0_21] : memref<1x3x2x2x8x8xf32, #tpu.memory_space<vmem>>, vector<1x1x1x1x8x8xf32>
    %7 = vector.shape_cast %6 : vector<1x1x1x1x8x8xf32> to vector<8x8xf32>
    %c0_22 = arith.constant 0 : index
    %8 = memref.load %arg3[%c0_22] : memref<48xf32, #tpu.memory_space<smem>>
    %9 = vector.broadcast %8 : f32 to vector<8x8xf32>
    %10 = arith.mulf %9, %1 : vector<8x8xf32>
    %c1_23 = arith.constant 1 : index
    %11 = memref.load %arg3[%c1_23] : memref<48xf32, #tpu.memory_space<smem>>
    %12 = vector.broadcast %11 : f32 to vector<8x8xf32>
    %13 = arith.mulf %12, %3 : vector<8x8xf32>
    %14 = arith.addf %10, %13 : vector<8x8xf32>
    %c2 = arith.constant 2 : index
    %15 = memref.load %arg3[%c2] : memref<48xf32, #tpu.memory_space<smem>>
    %16 = vector.broadcast %15 : f32 to vector<8x8xf32>
    %17 = arith.mulf %16, %5 : vector<8x8xf32>
    %18 = arith.addf %14, %17 : vector<8x8xf32>
    %c3 = arith.constant 3 : index
    %19 = memref.load %arg3[%c3] : memref<48xf32, #tpu.memory_space<smem>>
    %20 = vector.broadcast %19 : f32 to vector<8x8xf32>
    %21 = arith.mulf %20, %7 : vector<8x8xf32>
    %22 = arith.addf %18, %21 : vector<8x8xf32>
    %c0_24 = arith.constant 0 : index
    %c0_25 = arith.constant 0 : index
    %c0_26 = arith.constant 0 : index
    %c0_27 = arith.constant 0 : index
    %23 = vector.load %arg5[%c0_24, %c0_25, %c0_26, %c0_27] : memref<1x12x8x8xf32, #tpu.memory_space<vmem>>, vector<1x1x8x8xf32>
    %24 = vector.shape_cast %23 : vector<1x1x8x8xf32> to vector<8x8xf32>
    %25 = vector.shape_cast %22 : vector<8x8xf32> to vector<1x1x8x8xf32>
    tpu.vector_store %arg5[%c0_24, %c0_25, %c0_26, %c0_27], %25 {strides = array<i32>} : memref<1x12x8x8xf32, #tpu.memory_space<vmem>>, vector<1x1x8x8xf32>,
    %c4 = arith.constant 4 : index
    %26 = memref.load %arg3[%c4] : memref<48xf32, #tpu.memory_space<smem>>
    %27 = vector.broadcast %26 : f32 to vector<8x8xf32>
    %28 = arith.mulf %27, %1 : vector<8x8xf32>
    %c5 = arith.constant 5 : index
    %29 = memref.load %arg3[%c5] : memref<48xf32, #tpu.memory_space<smem>>
    %30 = vector.broadcast %29 : f32 to vector<8x8xf32>
    %31 = arith.mulf %30, %3 : vector<8x8xf32>
    %32 = arith.addf %28, %31 : vector<8x8xf32>
    %c6 = arith.constant 6 : index
    %33 = memref.load %arg3[%c6] : memref<48xf32, #tpu.memory_space<smem>>
    %34 = vector.broadcast %33 : f32 to vector<8x8xf32>
    %35 = arith.mulf %34, %5 : vector<8x8xf32>
    %36 = arith.addf %32, %35 : vector<8x8xf32>
    %c7 = arith.constant 7 : index
    %37 = memref.load %arg3[%c7] : memref<48xf32, #tpu.memory_space<smem>>
    %38 = vector.broadcast %37 : f32 to vector<8x8xf32>
    %39 = arith.mulf %38, %7 : vector<8x8xf32>
    %40 = arith.addf %36, %39 : vector<8x8xf32>
    %c0_28 = arith.constant 0 : index
    %c3_29 = arith.constant 3 : index
    %c0_30 = arith.constant 0 : index
    %c0_31 = arith.constant 0 : index
    %41 = vector.load %arg5[%c0_28, %c3_29, %c0_30, %c0_31] : memref<1x12x8x8xf32, #tpu.memory_space<vmem>>, vector<1x1x8x8xf32>
    %42 = vector.shape_cast %41 : vector<1x1x8x8xf32> to vector<8x8xf32>
    %43 = vector.shape_cast %40 : vector<8x8xf32> to vector<1x1x8x8xf32>
    tpu.vector_store %arg5[%c0_28, %c3_29, %c0_30, %c0_31], %43 {strides = array<i32>} : memref<1x12x8x8xf32, #tpu.memory_space<vmem>>, vector<1x1x8x8xf32>,
    %c8 = arith.constant 8 : index
    %44 = memref.load %arg3[%c8] : memref<48xf32, #tpu.memory_space<smem>>
    %45 = vector.broadcast %44 : f32 to vector<8x8xf32>
    %46 = arith.mulf %45, %1 : vector<8x8xf32>
    %c9 = arith.constant 9 : index
    %47 = memref.load %arg3[%c9] : memref<48xf32, #tpu.memory_space<smem>>
    %48 = vector.broadcast %47 : f32 to vector<8x8xf32>
    %49 = arith.mulf %48, %3 : vector<8x8xf32>
    %50 = arith.addf %46, %49 : vector<8x8xf32>
    %c10 = arith.constant 10 : index
    %51 = memref.load %arg3[%c10] : memref<48xf32, #tpu.memory_space<smem>>
    %52 = vector.broadcast %51 : f32 to vector<8x8xf32>
    %53 = arith.mulf %52, %5 : vector<8x8xf32>
    %54 = arith.addf %50, %53 : vector<8x8xf32>
    %c11 = arith.constant 11 : index
    %55 = memref.load %arg3[%c11] : memref<48xf32, #tpu.memory_space<smem>>
    %56 = vector.broadcast %55 : f32 to vector<8x8xf32>
    %57 = arith.mulf %56, %7 : vector<8x8xf32>
    %58 = arith.addf %54, %57 : vector<8x8xf32>
    %c0_32 = arith.constant 0 : index
    %c6_33 = arith.constant 6 : index
    %c0_34 = arith.constant 0 : index
    %c0_35 = arith.constant 0 : index
    %59 = vector.load %arg5[%c0_32, %c6_33, %c0_34, %c0_35] : memref<1x12x8x8xf32, #tpu.memory_space<vmem>>, vector<1x1x8x8xf32>
    %60 = vector.shape_cast %59 : vector<1x1x8x8xf32> to vector<8x8xf32>
    %61 = vector.shape_cast %58 : vector<8x8xf32> to vector<1x1x8x8xf32>
    tpu.vector_store %arg5[%c0_32, %c6_33, %c0_34, %c0_35], %61 {strides = array<i32>} : memref<1x12x8x8xf32, #tpu.memory_space<vmem>>, vector<1x1x8x8xf32>,
    %c12 = arith.constant 12 : index
    %62 = memref.load %arg3[%c12] : memref<48xf32, #tpu.memory_space<smem>>
    %63 = vector.broadcast %62 : f32 to vector<8x8xf32>
    %64 = arith.mulf %63, %1 : vector<8x8xf32>
    %c13 = arith.constant 13 : index
    %65 = memref.load %arg3[%c13] : memref<48xf32, #tpu.memory_space<smem>>
    %66 = vector.broadcast %65 : f32 to vector<8x8xf32>
    %67 = arith.mulf %66, %3 : vector<8x8xf32>
    %68 = arith.addf %64, %67 : vector<8x8xf32>
    %c14 = arith.constant 14 : index
    %69 = memref.load %arg3[%c14] : memref<48xf32, #tpu.memory_space<smem>>
    %70 = vector.broadcast %69 : f32 to vector<8x8xf32>
    %71 = arith.mulf %70, %5 : vector<8x8xf32>
    %72 = arith.addf %68, %71 : vector<8x8xf32>
    %c15 = arith.constant 15 : index
    %73 = memref.load %arg3[%c15] : memref<48xf32, #tpu.memory_space<smem>>
    %74 = vector.broadcast %73 : f32 to vector<8x8xf32>
    %75 = arith.mulf %74, %7 : vector<8x8xf32>
    %76 = arith.addf %72, %75 : vector<8x8xf32>
    %c0_36 = arith.constant 0 : index
    %c9_37 = arith.constant 9 : index
    %c0_38 = arith.constant 0 : index
    %c0_39 = arith.constant 0 : index
    %77 = vector.load %arg5[%c0_36, %c9_37, %c0_38, %c0_39] : memref<1x12x8x8xf32, #tpu.memory_space<vmem>>, vector<1x1x8x8xf32>
    %78 = vector.shape_cast %77 : vector<1x1x8x8xf32> to vector<8x8xf32>
    %79 = vector.shape_cast %76 : vector<8x8xf32> to vector<1x1x8x8xf32>
    tpu.vector_store %arg5[%c0_36, %c9_37, %c0_38, %c0_39], %79 {strides = array<i32>} : memref<1x12x8x8xf32, #tpu.memory_space<vmem>>, vector<1x1x8x8xf32>,
    %c0_40 = arith.constant 0 : index
    %c1_41 = arith.constant 1 : index
    %c0_42 = arith.constant 0 : index
    %c0_43 = arith.constant 0 : index
    %c0_44 = arith.constant 0 : index
    %c0_45 = arith.constant 0 : index
    %80 = vector.load %arg4[%c0_40, %c1_41, %c0_42, %c0_43, %c0_44, %c0_45] : memref<1x3x2x2x8x8xf32, #tpu.memory_space<vmem>>, vector<1x1x1x1x8x8xf32>
    %81 = vector.shape_cast %80 : vector<1x1x1x1x8x8xf32> to vector<8x8xf32>
    %c0_46 = arith.constant 0 : index
    %c1_47 = arith.constant 1 : index
    %c0_48 = arith.constant 0 : index
    %c1_49 = arith.constant 1 : index
    %c0_50 = arith.constant 0 : index
    %c0_51 = arith.constant 0 : index
    %82 = vector.load %arg4[%c0_46, %c1_47, %c0_48, %c1_49, %c0_50, %c0_51] : memref<1x3x2x2x8x8xf32, #tpu.memory_space<vmem>>, vector<1x1x1x1x8x8xf32>
    %83 = vector.shape_cast %82 : vector<1x1x1x1x8x8xf32> to vector<8x8xf32>
    %c0_52 = arith.constant 0 : index
    %c1_53 = arith.constant 1 : index
    %c1_54 = arith.constant 1 : index
    %c0_55 = arith.constant 0 : index
    %c0_56 = arith.constant 0 : index
    %c0_57 = arith.constant 0 : index
    %84 = vector.load %arg4[%c0_52, %c1_53, %c1_54, %c0_55, %c0_56, %c0_57] : memref<1x3x2x2x8x8xf32, #tpu.memory_space<vmem>>, vector<1x1x1x1x8x8xf32>
    %85 = vector.shape_cast %84 : vector<1x1x1x1x8x8xf32> to vector<8x8xf32>
    %c0_58 = arith.constant 0 : index
    %c1_59 = arith.constant 1 : index
    %c1_60 = arith.constant 1 : index
    %c1_61 = arith.constant 1 : index
    %c0_62 = arith.constant 0 : index
    %c0_63 = arith.constant 0 : index
    %86 = vector.load %arg4[%c0_58, %c1_59, %c1_60, %c1_61, %c0_62, %c0_63] : memref<1x3x2x2x8x8xf32, #tpu.memory_space<vmem>>, vector<1x1x1x1x8x8xf32>
    %87 = vector.shape_cast %86 : vector<1x1x1x1x8x8xf32> to vector<8x8xf32>
    %c16 = arith.constant 16 : index
    %88 = memref.load %arg3[%c16] : memref<48xf32, #tpu.memory_space<smem>>
    %89 = vector.broadcast %88 : f32 to vector<8x8xf32>
    %90 = arith.mulf %89, %81 : vector<8x8xf32>
    %c17 = arith.constant 17 : index
    %91 = memref.load %arg3[%c17] : memref<48xf32, #tpu.memory_space<smem>>
    %92 = vector.broadcast %91 : f32 to vector<8x8xf32>
    %93 = arith.mulf %92, %83 : vector<8x8xf32>
    %94 = arith.addf %90, %93 : vector<8x8xf32>
    %c18 = arith.constant 18 : index
    %95 = memref.load %arg3[%c18] : memref<48xf32, #tpu.memory_space<smem>>
    %96 = vector.broadcast %95 : f32 to vector<8x8xf32>
    %97 = arith.mulf %96, %85 : vector<8x8xf32>
    %98 = arith.addf %94, %97 : vector<8x8xf32>
    %c19 = arith.constant 19 : index
    %99 = memref.load %arg3[%c19] : memref<48xf32, #tpu.memory_space<smem>>
    %100 = vector.broadcast %99 : f32 to vector<8x8xf32>
    %101 = arith.mulf %100, %87 : vector<8x8xf32>
    %102 = arith.addf %98, %101 : vector<8x8xf32>
    %c0_64 = arith.constant 0 : index
    %c1_65 = arith.constant 1 : index
    %c0_66 = arith.constant 0 : index
    %c0_67 = arith.constant 0 : index
    %103 = vector.load %arg5[%c0_64, %c1_65, %c0_66, %c0_67] : memref<1x12x8x8xf32, #tpu.memory_space<vmem>>, vector<1x1x8x8xf32>
    %104 = vector.shape_cast %103 : vector<1x1x8x8xf32> to vector<8x8xf32>
    %105 = vector.shape_cast %102 : vector<8x8xf32> to vector<1x1x8x8xf32>
    tpu.vector_store %arg5[%c0_64, %c1_65, %c0_66, %c0_67], %105 {strides = array<i32>} : memref<1x12x8x8xf32, #tpu.memory_space<vmem>>, vector<1x1x8x8xf32>,
    %c20 = arith.constant 20 : index
    %106 = memref.load %arg3[%c20] : memref<48xf32, #tpu.memory_space<smem>>
    %107 = vector.broadcast %106 : f32 to vector<8x8xf32>
    %108 = arith.mulf %107, %81 : vector<8x8xf32>
    %c21 = arith.constant 21 : index
    %109 = memref.load %arg3[%c21] : memref<48xf32, #tpu.memory_space<smem>>
    %110 = vector.broadcast %109 : f32 to vector<8x8xf32>
    %111 = arith.mulf %110, %83 : vector<8x8xf32>
    %112 = arith.addf %108, %111 : vector<8x8xf32>
    %c22 = arith.constant 22 : index
    %113 = memref.load %arg3[%c22] : memref<48xf32, #tpu.memory_space<smem>>
    %114 = vector.broadcast %113 : f32 to vector<8x8xf32>
    %115 = arith.mulf %114, %85 : vector<8x8xf32>
    %116 = arith.addf %112, %115 : vector<8x8xf32>
    %c23 = arith.constant 23 : index
    %117 = memref.load %arg3[%c23] : memref<48xf32, #tpu.memory_space<smem>>
    %118 = vector.broadcast %117 : f32 to vector<8x8xf32>
    %119 = arith.mulf %118, %87 : vector<8x8xf32>
    %120 = arith.addf %116, %119 : vector<8x8xf32>
    %c0_68 = arith.constant 0 : index
    %c4_69 = arith.constant 4 : index
    %c0_70 = arith.constant 0 : index
    %c0_71 = arith.constant 0 : index
    %121 = vector.load %arg5[%c0_68, %c4_69, %c0_70, %c0_71] : memref<1x12x8x8xf32, #tpu.memory_space<vmem>>, vector<1x1x8x8xf32>
    %122 = vector.shape_cast %121 : vector<1x1x8x8xf32> to vector<8x8xf32>
    %123 = vector.shape_cast %120 : vector<8x8xf32> to vector<1x1x8x8xf32>
    tpu.vector_store %arg5[%c0_68, %c4_69, %c0_70, %c0_71], %123 {strides = array<i32>} : memref<1x12x8x8xf32, #tpu.memory_space<vmem>>, vector<1x1x8x8xf32>,
    %c24 = arith.constant 24 : index
    %124 = memref.load %arg3[%c24] : memref<48xf32, #tpu.memory_space<smem>>
    %125 = vector.broadcast %124 : f32 to vector<8x8xf32>
    %126 = arith.mulf %125, %81 : vector<8x8xf32>
    %c25 = arith.constant 25 : index
    %127 = memref.load %arg3[%c25] : memref<48xf32, #tpu.memory_space<smem>>
    %128 = vector.broadcast %127 : f32 to vector<8x8xf32>
    %129 = arith.mulf %128, %83 : vector<8x8xf32>
    %130 = arith.addf %126, %129 : vector<8x8xf32>
    %c26 = arith.constant 26 : index
    %131 = memref.load %arg3[%c26] : memref<48xf32, #tpu.memory_space<smem>>
    %132 = vector.broadcast %131 : f32 to vector<8x8xf32>
    %133 = arith.mulf %132, %85 : vector<8x8xf32>
    %134 = arith.addf %130, %133 : vector<8x8xf32>
    %c27 = arith.constant 27 : index
    %135 = memref.load %arg3[%c27] : memref<48xf32, #tpu.memory_space<smem>>
    %136 = vector.broadcast %135 : f32 to vector<8x8xf32>
    %137 = arith.mulf %136, %87 : vector<8x8xf32>
    %138 = arith.addf %134, %137 : vector<8x8xf32>
    %c0_72 = arith.constant 0 : index
    %c7_73 = arith.constant 7 : index
    %c0_74 = arith.constant 0 : index
    %c0_75 = arith.constant 0 : index
    %139 = vector.load %arg5[%c0_72, %c7_73, %c0_74, %c0_75] : memref<1x12x8x8xf32, #tpu.memory_space<vmem>>, vector<1x1x8x8xf32>
    %140 = vector.shape_cast %139 : vector<1x1x8x8xf32> to vector<8x8xf32>
    %141 = vector.shape_cast %138 : vector<8x8xf32> to vector<1x1x8x8xf32>
    tpu.vector_store %arg5[%c0_72, %c7_73, %c0_74, %c0_75], %141 {strides = array<i32>} : memref<1x12x8x8xf32, #tpu.memory_space<vmem>>, vector<1x1x8x8xf32>,
    %c28 = arith.constant 28 : index
    %142 = memref.load %arg3[%c28] : memref<48xf32, #tpu.memory_space<smem>>
    %143 = vector.broadcast %142 : f32 to vector<8x8xf32>
    %144 = arith.mulf %143, %81 : vector<8x8xf32>
    %c29 = arith.constant 29 : index
    %145 = memref.load %arg3[%c29] : memref<48xf32, #tpu.memory_space<smem>>
    %146 = vector.broadcast %145 : f32 to vector<8x8xf32>
    %147 = arith.mulf %146, %83 : vector<8x8xf32>
    %148 = arith.addf %144, %147 : vector<8x8xf32>
    %c30 = arith.constant 30 : index
    %149 = memref.load %arg3[%c30] : memref<48xf32, #tpu.memory_space<smem>>
    %150 = vector.broadcast %149 : f32 to vector<8x8xf32>
    %151 = arith.mulf %150, %85 : vector<8x8xf32>
    %152 = arith.addf %148, %151 : vector<8x8xf32>
    %c31 = arith.constant 31 : index
    %153 = memref.load %arg3[%c31] : memref<48xf32, #tpu.memory_space<smem>>
    %154 = vector.broadcast %153 : f32 to vector<8x8xf32>
    %155 = arith.mulf %154, %87 : vector<8x8xf32>
    %156 = arith.addf %152, %155 : vector<8x8xf32>
    %c0_76 = arith.constant 0 : index
    %c10_77 = arith.constant 10 : index
    %c0_78 = arith.constant 0 : index
    %c0_79 = arith.constant 0 : index
    %157 = vector.load %arg5[%c0_76, %c10_77, %c0_78, %c0_79] : memref<1x12x8x8xf32, #tpu.memory_space<vmem>>, vector<1x1x8x8xf32>
    %158 = vector.shape_cast %157 : vector<1x1x8x8xf32> to vector<8x8xf32>
    %159 = vector.shape_cast %156 : vector<8x8xf32> to vector<1x1x8x8xf32>
    tpu.vector_store %arg5[%c0_76, %c10_77, %c0_78, %c0_79], %159 {strides = array<i32>} : memref<1x12x8x8xf32, #tpu.memory_space<vmem>>, vector<1x1x8x8xf32>,
    %c0_80 = arith.constant 0 : index
    %c2_81 = arith.constant 2 : index
    %c0_82 = arith.constant 0 : index
    %c0_83 = arith.constant 0 : index
    %c0_84 = arith.constant 0 : index
    %c0_85 = arith.constant 0 : index
    %160 = vector.load %arg4[%c0_80, %c2_81, %c0_82, %c0_83, %c0_84, %c0_85] : memref<1x3x2x2x8x8xf32, #tpu.memory_space<vmem>>, vector<1x1x1x1x8x8xf32>
    %161 = vector.shape_cast %160 : vector<1x1x1x1x8x8xf32> to vector<8x8xf32>
    %c0_86 = arith.constant 0 : index
    %c2_87 = arith.constant 2 : index
    %c0_88 = arith.constant 0 : index
    %c1_89 = arith.constant 1 : index
    %c0_90 = arith.constant 0 : index
    %c0_91 = arith.constant 0 : index
    %162 = vector.load %arg4[%c0_86, %c2_87, %c0_88, %c1_89, %c0_90, %c0_91] : memref<1x3x2x2x8x8xf32, #tpu.memory_space<vmem>>, vector<1x1x1x1x8x8xf32>
    %163 = vector.shape_cast %162 : vector<1x1x1x1x8x8xf32> to vector<8x8xf32>
    %c0_92 = arith.constant 0 : index
    %c2_93 = arith.constant 2 : index
    %c1_94 = arith.constant 1 : index
    %c0_95 = arith.constant 0 : index
    %c0_96 = arith.constant 0 : index
    %c0_97 = arith.constant 0 : index
    %164 = vector.load %arg4[%c0_92, %c2_93, %c1_94, %c0_95, %c0_96, %c0_97] : memref<1x3x2x2x8x8xf32, #tpu.memory_space<vmem>>, vector<1x1x1x1x8x8xf32>
    %165 = vector.shape_cast %164 : vector<1x1x1x1x8x8xf32> to vector<8x8xf32>
    %c0_98 = arith.constant 0 : index
    %c2_99 = arith.constant 2 : index
    %c1_100 = arith.constant 1 : index
    %c1_101 = arith.constant 1 : index
    %c0_102 = arith.constant 0 : index
    %c0_103 = arith.constant 0 : index
    %166 = vector.load %arg4[%c0_98, %c2_99, %c1_100, %c1_101, %c0_102, %c0_103] : memref<1x3x2x2x8x8xf32, #tpu.memory_space<vmem>>, vector<1x1x1x1x8x8xf32>
    %167 = vector.shape_cast %166 : vector<1x1x1x1x8x8xf32> to vector<8x8xf32>
    %c32 = arith.constant 32 : index
    %168 = memref.load %arg3[%c32] : memref<48xf32, #tpu.memory_space<smem>>
    %169 = vector.broadcast %168 : f32 to vector<8x8xf32>
    %170 = arith.mulf %169, %161 : vector<8x8xf32>
    %c33 = arith.constant 33 : index
    %171 = memref.load %arg3[%c33] : memref<48xf32, #tpu.memory_space<smem>>
    %172 = vector.broadcast %171 : f32 to vector<8x8xf32>
    %173 = arith.mulf %172, %163 : vector<8x8xf32>
    %174 = arith.addf %170, %173 : vector<8x8xf32>
    %c34 = arith.constant 34 : index
    %175 = memref.load %arg3[%c34] : memref<48xf32, #tpu.memory_space<smem>>
    %176 = vector.broadcast %175 : f32 to vector<8x8xf32>
    %177 = arith.mulf %176, %165 : vector<8x8xf32>
    %178 = arith.addf %174, %177 : vector<8x8xf32>
    %c35 = arith.constant 35 : index
    %179 = memref.load %arg3[%c35] : memref<48xf32, #tpu.memory_space<smem>>
    %180 = vector.broadcast %179 : f32 to vector<8x8xf32>
    %181 = arith.mulf %180, %167 : vector<8x8xf32>
    %182 = arith.addf %178, %181 : vector<8x8xf32>
    %c0_104 = arith.constant 0 : index
    %c2_105 = arith.constant 2 : index
    %c0_106 = arith.constant 0 : index
    %c0_107 = arith.constant 0 : index
    %183 = vector.load %arg5[%c0_104, %c2_105, %c0_106, %c0_107] : memref<1x12x8x8xf32, #tpu.memory_space<vmem>>, vector<1x1x8x8xf32>
    %184 = vector.shape_cast %183 : vector<1x1x8x8xf32> to vector<8x8xf32>
    %185 = vector.shape_cast %182 : vector<8x8xf32> to vector<1x1x8x8xf32>
    tpu.vector_store %arg5[%c0_104, %c2_105, %c0_106, %c0_107], %185 {strides = array<i32>} : memref<1x12x8x8xf32, #tpu.memory_space<vmem>>, vector<1x1x8x8xf32>,
    %c36 = arith.constant 36 : index
    %186 = memref.load %arg3[%c36] : memref<48xf32, #tpu.memory_space<smem>>
    %187 = vector.broadcast %186 : f32 to vector<8x8xf32>
    %188 = arith.mulf %187, %161 : vector<8x8xf32>
    %c37 = arith.constant 37 : index
    %189 = memref.load %arg3[%c37] : memref<48xf32, #tpu.memory_space<smem>>
    %190 = vector.broadcast %189 : f32 to vector<8x8xf32>
    %191 = arith.mulf %190, %163 : vector<8x8xf32>
    %192 = arith.addf %188, %191 : vector<8x8xf32>
    %c38 = arith.constant 38 : index
    %193 = memref.load %arg3[%c38] : memref<48xf32, #tpu.memory_space<smem>>
    %194 = vector.broadcast %193 : f32 to vector<8x8xf32>
    %195 = arith.mulf %194, %165 : vector<8x8xf32>
    %196 = arith.addf %192, %195 : vector<8x8xf32>
    %c39 = arith.constant 39 : index
    %197 = memref.load %arg3[%c39] : memref<48xf32, #tpu.memory_space<smem>>
    %198 = vector.broadcast %197 : f32 to vector<8x8xf32>
    %199 = arith.mulf %198, %167 : vector<8x8xf32>
    %200 = arith.addf %196, %199 : vector<8x8xf32>
    %c0_108 = arith.constant 0 : index
    %c5_109 = arith.constant 5 : index
    %c0_110 = arith.constant 0 : index
    %c0_111 = arith.constant 0 : index
    %201 = vector.load %arg5[%c0_108, %c5_109, %c0_110, %c0_111] : memref<1x12x8x8xf32, #tpu.memory_space<vmem>>, vector<1x1x8x8xf32>
    %202 = vector.shape_cast %201 : vector<1x1x8x8xf32> to vector<8x8xf32>
    %203 = vector.shape_cast %200 : vector<8x8xf32> to vector<1x1x8x8xf32>
    tpu.vector_store %arg5[%c0_108, %c5_109, %c0_110, %c0_111], %203 {strides = array<i32>} : memref<1x12x8x8xf32, #tpu.memory_space<vmem>>, vector<1x1x8x8xf32>,
    %c40 = arith.constant 40 : index
    %204 = memref.load %arg3[%c40] : memref<48xf32, #tpu.memory_space<smem>>
    %205 = vector.broadcast %204 : f32 to vector<8x8xf32>
    %206 = arith.mulf %205, %161 : vector<8x8xf32>
    %c41 = arith.constant 41 : index
    %207 = memref.load %arg3[%c41] : memref<48xf32, #tpu.memory_space<smem>>
    %208 = vector.broadcast %207 : f32 to vector<8x8xf32>
    %209 = arith.mulf %208, %163 : vector<8x8xf32>
    %210 = arith.addf %206, %209 : vector<8x8xf32>
    %c42 = arith.constant 42 : index
    %211 = memref.load %arg3[%c42] : memref<48xf32, #tpu.memory_space<smem>>
    %212 = vector.broadcast %211 : f32 to vector<8x8xf32>
    %213 = arith.mulf %212, %165 : vector<8x8xf32>
    %214 = arith.addf %210, %213 : vector<8x8xf32>
    %c43 = arith.constant 43 : index
    %215 = memref.load %arg3[%c43] : memref<48xf32, #tpu.memory_space<smem>>
    %216 = vector.broadcast %215 : f32 to vector<8x8xf32>
    %217 = arith.mulf %216, %167 : vector<8x8xf32>
    %218 = arith.addf %214, %217 : vector<8x8xf32>
    %c0_112 = arith.constant 0 : index
    %c8_113 = arith.constant 8 : index
    %c0_114 = arith.constant 0 : index
    %c0_115 = arith.constant 0 : index
    %219 = vector.load %arg5[%c0_112, %c8_113, %c0_114, %c0_115] : memref<1x12x8x8xf32, #tpu.memory_space<vmem>>, vector<1x1x8x8xf32>
    %220 = vector.shape_cast %219 : vector<1x1x8x8xf32> to vector<8x8xf32>
    %221 = vector.shape_cast %218 : vector<8x8xf32> to vector<1x1x8x8xf32>
    tpu.vector_store %arg5[%c0_112, %c8_113, %c0_114, %c0_115], %221 {strides = array<i32>} : memref<1x12x8x8xf32, #tpu.memory_space<vmem>>, vector<1x1x8x8xf32>,
    %c44 = arith.constant 44 : index
    %222 = memref.load %arg3[%c44] : memref<48xf32, #tpu.memory_space<smem>>
    %223 = vector.broadcast %222 : f32 to vector<8x8xf32>
    %224 = arith.mulf %223, %161 : vector<8x8xf32>
    %c45 = arith.constant 45 : index
    %225 = memref.load %arg3[%c45] : memref<48xf32, #tpu.memory_space<smem>>
    %226 = vector.broadcast %225 : f32 to vector<8x8xf32>
    %227 = arith.mulf %226, %163 : vector<8x8xf32>
    %228 = arith.addf %224, %227 : vector<8x8xf32>
    %c46 = arith.constant 46 : index
    %229 = memref.load %arg3[%c46] : memref<48xf32, #tpu.memory_space<smem>>
    %230 = vector.broadcast %229 : f32 to vector<8x8xf32>
    %231 = arith.mulf %230, %165 : vector<8x8xf32>
    %232 = arith.addf %228, %231 : vector<8x8xf32>
    %c47 = arith.constant 47 : index
    %233 = memref.load %arg3[%c47] : memref<48xf32, #tpu.memory_space<smem>>
    %234 = vector.broadcast %233 : f32 to vector<8x8xf32>
    %235 = arith.mulf %234, %167 : vector<8x8xf32>
    %236 = arith.addf %232, %235 : vector<8x8xf32>
    %c0_116 = arith.constant 0 : index
    %c11_117 = arith.constant 11 : index
    %c0_118 = arith.constant 0 : index
    %c0_119 = arith.constant 0 : index
    %237 = vector.load %arg5[%c0_116, %c11_117, %c0_118, %c0_119] : memref<1x12x8x8xf32, #tpu.memory_space<vmem>>, vector<1x1x8x8xf32>
    %238 = vector.shape_cast %237 : vector<1x1x8x8xf32> to vector<8x8xf32>
    %239 = vector.shape_cast %236 : vector<8x8xf32> to vector<1x1x8x8xf32>
    tpu.vector_store %arg5[%c0_116, %c11_117, %c0_118, %c0_119], %239 {strides = array<i32>} : memref<1x12x8x8xf32, #tpu.memory_space<vmem>>, vector<1x1x8x8xf32>,
    return
  }
  func.func @transform_0(%arg0: i32, %arg1: i32, %arg2: i32) -> i32 {
    %c0_i32 = arith.constant 0 : i32
    %c0_i32_0 = arith.constant 0 : i32
    return %c0_i32 : i32
  }
  func.func @transform_1(%arg0: i32, %arg1: i32, %arg2: i32) -> (i32, i32, i32, i32, i32, i32) {
    %c0_i32 = arith.constant 0 : i32
    %c0_i32_0 = arith.constant 0 : i32
    %c0_i32_1 = arith.constant 0 : i32
    %c0_i32_2 = arith.constant 0 : i32
    return %arg0, %c0_i32, %c0_i32_0, %c0_i32_1, %arg1, %arg2 : i32, i32, i32, i32, i32, i32
  }
  func.func @transform_2(%arg0: i32, %arg1: i32, %arg2: i32) -> (i32, i32, i32, i32) {
    %c0_i32 = arith.constant 0 : i32
    %c0_i32_0 = arith.constant 0 : i32
    return %arg0, %c0_i32, %arg1, %arg2 : i32, i32, i32, i32
  }
}

</mosaic_0001>

<bundles_post_ra>
// kernel: wavelet_transform.1
= control target key start
LH: loop header
LB: loop body
LE: loop exit
PB: predicated region body
PF: predicated region fallthrough
CT: control target
= control target key end

     0   :  { %7 = vsyncpa [#allocation3], 0  ;;  %s729_s9 = smov 0   ;;  %s731_s10 = smov 0   ;;  %s984_s0 = inlined_call_operand.vmem [shape: f32[48], index: 0, kind: input, shape index: {}]   ;;  %s985_s1 = inlined_call_operand.vmem [shape: f32[2,3,2,2,8,8], index: 1, kind: input, shape index: {}]   ;;  %s986_s2 = inlined_call_operand.vmem [shape: f32[2,12,8,8], index: 2, kind: output, shape index: {}]  }
   0x1   :  { %s733_s11 = smov 0  }
   0x2 LB: > { %s554_s12 = sadd.s32 4294967295, %s711_s11   ;;  %s32_s13 = sadd.s32 1, %s707_s10  ;;  %s711_s11 = sphi %s733_s11, %s13_s11   ;;  %s707_s10 = sphi %s731_s10, %s990_s10   ;;  %s703_s9 = sphi %s729_s9, %s989_s9  }
   0x3   : > { %p34_p0 = scmp.ge.s32.totalorder %s32_s13, 2  ;;  %p556_p1 = scmp.ge.s32.totalorder %s711_s11, 1 }
   0x4   : > { %p118_p2 = scmp.lt.s32.totalorder %s711_s11, 3  ;;  %p754_p4 = scmp.eq.s32.totalorder %s554_s12, 0 }
   0x5   : > { %s992_s13 = smov (%p34_p0, %s32_s13), 0  ;;  %s131_s18 = sshll.u32 %s984_s0, 4  ;;  %s132_s18 = int_to_ptr.vmem [resolvable:$true] %s131_s18 }
   0x6   : > { %p750_p3 = pnand %p556_p1, %p118_p2  ;;  %s670_s19 = scalar_lea.vmem %s132_s18, 16 }
   0x7   : > { %p671_p7 = scmp.ne.s32.totalorder %s132_s18, %s670_s19  ;;  %p678_p11 = scmp.lt.s32.totalorder %s132_s18, %s132_s18 }
   0x8   : > { %p639_p5 = pneg %p750_p3  ;;  %p679_p12 = scmp.lt.s32.totalorder %s670_s19, %s670_s19 }
   0xa   : > { %p640_p6 = pnand %p754_p4, %p639_p5  ;;  %p680_p13 = por %p679_p12, %p678_p11 }
   0xc   : > { %p672_p8 = pneg %p640_p6 }
   0xe   : > { %p673_p9 = pnand %p672_p8, %p671_p7 }
  0x10   : > { %p674_p10 = pneg %p673_p9 }
  0x12   : > { %p681_p0 = pnand %p680_p13, %p674_p10 }
  0x14   : > { %684 = shalt.err (!%p681_p0)
}
  0x15   : > { %s713_s20 = smov [#allocation2]   ;;  %158 = sbr.rel (%p750_p3) target bundleno = 78 (0x4e), region = 28 }
  0x16   : > { %642 = dma.vmem_to_smem (!%p640_p6), %s132_s18, 16, %s713_s20, [#allocation3]  }
  0x1c   : > { %698 = dma.done.wait (%p754_p4), [#allocation3], 16  }
  0x1d   : > { %700 = vsyncadd (%p754_p4), [#allocation3], 4294967280 }
  0x1e   : > { %164 = sfence }
  0x1f   : > { %p193_p1 = scmp.lt.s32.totalorder %s703_s9, 1  ;;  %s222_s21 = sld [smem:[#allocation2]]  ;;  %vm237_vm0 = vcmask 64512  }
  0x20   : > { %s566_s22 = sld [smem:[#allocation2 + $0x1]]  ;;  %s567_s23 = sld [smem:[#allocation2 + $0x2]] }
  0x21   : > { %s994_s9 = smov (!%p193_p1, %s703_s9), 1  ;;  %s568_s24 = sld [smem:[#allocation2 + $0x3]] }
  0x22   : > { %s569_s25 = sld [smem:[#allocation2 + $0x4]]  ;;  %s634_s26 = smul.u32 96, %s994_s9 }
  0x23   : > { %s570_s27 = sld [smem:[#allocation2 + $0x5]]  ;;  %s773_s28 = sld [smem:[#allocation2 + $0x6]] }
  0x24   : > { %s775_s29 = sld [smem:[#allocation2 + $0x7]]  ;;  %s780_s4 = scalar_lea.vmem %s985_s1, %s634_s26 }
  0x25   : > { %v223_v0 = vstv %s222_s21  ;;  %s785_s7 = scalar_lea.vmem %s986_s2, %s634_s26  ;;  %v215_v1 = vld [vmem:[%s780_s4] sm:$0xff]  ;;  %v563_v2 = vld [vmem:[%s780_s4 + $0x8] sm:$0xff]  ;;  %v564_v3 = vld [vmem:[%s780_s4 + $0x10] sm:$0xff]  ;;  %s790_s8 = sld [smem:[#allocation2 + $0x8]] }
  0x26   : > { %v226_v4 = vstv %s566_s22  ;;  %v793_v5 = vld [vmem:[%s780_s4 + $0x18] sm:$0xff]  ;;  %v224_v6 = vmul.f32 %v223_v0, %v215_v1  ;;  %v230_v8 = vstv %s567_s23  ;;  %s795_s9 = sld [smem:[#allocation2 + $0x9]]  ;;  %s797_s12 = sld [smem:[#allocation2 + $0xa]]  ;;  %v840_v36 = vld [vmem:[%s780_s4 + $0x20] sm:$0xff] }
  0x27   : > { %v227_v7 = vmul.f32 %v563_v2, %v226_v4  ;;  %v231_v9 = vmul.f32 %v564_v3, %v230_v8  ;;  %v234_v10 = vstv %s568_s24  ;;  %s799_s14 = sld [smem:[#allocation2 + $0xb]]  ;;  %s801_s15 = sld [smem:[#allocation2 + $0xc]]  ;;  %v847_v41 = vld [vmem:[%s780_s4 + $0x28] sm:$0xff]  ;;  %v850_v42 = vld [vmem:[%s780_s4 + $0x30] sm:$0xff]  ;;  %v856_v45 = vld [vmem:[%s780_s4 + $0x38] sm:$0xff] }
  0x28   : > { %v240_v11 = vstv %s569_s25  ;;  %v235_v13 = vmul.f32 %v793_v5, %v234_v10  ;;  %s804_s16 = sld [smem:[#allocation2 + $0xd]]  ;;  %s806_s17 = sld [smem:[#allocation2 + $0xe]] }
  0x29   : > { %v228_v12 = vadd.f32 %v227_v7, %v224_v6  ;;  %v241_v14 = vmul.f32 %v240_v11, %v215_v1  ;;  %v243_v15 = vstv %s570_s27  ;;  %v247_v17 = vstv %s773_s28  ;;  %s810_s18 = sld [smem:[#allocation2 + $0xf]]  ;;  %s812_s19 = sld [smem:[#allocation2 + $0x10]] }
  0x2a   : > { %v244_v16 = vmul.f32 %v563_v2, %v243_v15  ;;  %v251_v18 = vstv %s775_s29  ;;  %v248_v20 = vmul.f32 %v564_v3, %v247_v17  ;;  %s814_s20 = sld [smem:[#allocation2 + $0x11]]  ;;  %s816_s21 = sld [smem:[#allocation2 + $0x12]] }
  0x2b   : > { %v232_v19 = vadd.f32 %v231_v9, %v228_v12  ;;  %v252_v22 = vmul.f32 %v793_v5, %v251_v18  ;;  %v257_v23 = vstv %s790_s8  ;;  %s820_s22 = sld [smem:[#allocation2 + $0x13]]  ;;  %s822_s23 = sld [smem:[#allocation2 + $0x14]] }
  0x2c   : > { %v245_v21 = vadd.f32 %v244_v16, %v241_v14  ;;  %v258_v25 = vmul.f32 %v257_v23, %v215_v1  ;;  %v260_v26 = vstv %s795_s9  ;;  %v264_v27 = vstv %s797_s12  ;;  %s826_s24 = sld [smem:[#allocation2 + $0x15]]  ;;  %s828_s25 = sld [smem:[#allocation2 + $0x16]] }
  0x2d   : > { %v236_v24 = vadd.f32 %v235_v13, %v232_v19  ;;  %v261_v29 = vmul.f32 %v563_v2, %v260_v26  ;;  %v265_v30 = vmul.f32 %v564_v3, %v264_v27  ;;  %v268_v31 = vstv %s799_s14  ;;  %s831_s26 = sld [smem:[#allocation2 + $0x17]]  ;;  %s842_s27 = sld [smem:[#allocation2 + $0x18]] }
  0x2e   : > { %v249_v28 = vadd.f32 %v248_v20, %v245_v21  ;;  %v269_v32 = vmul.f32 %v793_v5, %v268_v31  ;;  %v274_v33 = vstv %s801_s15  ;;  %v277_v34 = vstv %s804_s16  ;;  %s844_s28 = sld [smem:[#allocation2 + $0x19]]  ;;  %s852_s29 = sld [smem:[#allocation2 + $0x1a]]  ;;  %v608_v20 = vld [vmem:[%s780_s4 + $0x40] sm:$0xff]  ;;  %v609_v21 = vld [vmem:[%s780_s4 + $0x48] sm:$0xff] }
  0x2f   : > { %238 = vst.msk [vmem:[%s785_s7] sm:$0xff] %vm237_vm0, %v236_v24  ;;  %v281_v35 = vstv %s806_s17  ;;  %v262_v38 = vadd.f32 %v261_v29, %v258_v25  ;;  %v275_v39 = vmul.f32 %v274_v33, %v215_v1  ;;  %v278_v40 = vmul.f32 %v563_v2, %v277_v34  ;;  %s860_s30 = sld [smem:[#allocation2 + $0x1b]]  ;;  %s862_s3 = sld [smem:[#allocation2 + $0x1c]] }
  0x30   : > { %v253_v37 = vadd.f32 %v252_v22, %v249_v28  ;;  %v282_v43 = vmul.f32 %v564_v3, %v281_v35  ;;  %v285_v44 = vstv %s810_s18  ;;  %v299_v46 = vstv %s812_s19  ;;  %s868_s5 = sld [smem:[#allocation2 + $0x1d]]  ;;  %s870_s6 = sld [smem:[#allocation2 + $0x1e]]  ;;  %v610_v22 = vld [vmem:[%s780_s4 + $0x50] sm:$0xff] }
  0x31   : > { %v302_v47 = vstv %s814_s20  ;;  %v266_v48 = vadd.f32 %v265_v30, %v262_v38  ;;  %v279_v49 = vadd.f32 %v278_v40, %v275_v39  ;;  %v286_v50 = vmul.f32 %v793_v5, %v285_v44  ;;  %s876_s8 = sld [smem:[#allocation2 + $0x1f]]  ;;  %s878_s9 = sld [smem:[#allocation2 + $0x20]] }
  0x32   : > { %573 = vst.msk [vmem:[%s785_s7 + $0x18] sm:$0xff] %vm237_vm0, %v253_v37  ;;  %v300_v51 = vmul.f32 %v840_v36, %v299_v46  ;;  %v303_v52 = vmul.f32 %v847_v41, %v302_v47  ;;  %v306_v53 = vstv %s816_s21  ;;  %v310_v54 = vstv %s820_s22  ;;  %s885_s12 = sld [smem:[#allocation2 + $0x21]]  ;;  %s887_s14 = sld [smem:[#allocation2 + $0x22]] }
  0x33   : > { %v316_v55 = vstv %s822_s23  ;;  %v270_v56 = vadd.f32 %v269_v32, %v266_v48  ;;  %v283_v57 = vadd.f32 %v282_v43, %v279_v49  ;;  %v307_v58 = vmul.f32 %v850_v42, %v306_v53  ;;  %s894_s15 = sld [smem:[#allocation2 + $0x23]]  ;;  %s896_s16 = sld [smem:[#allocation2 + $0x24]]  ;;  %v611_v32 = vld [vmem:[%s780_s4 + $0x58] sm:$0xff] }
  0x34   : > { %v311_v59 = vmul.f32 %v856_v45, %v310_v54  ;;  %v304_v60 = vadd.f32 %v303_v52, %v300_v51  ;;  %v317_v61 = vmul.f32 %v840_v36, %v316_v55  ;;  %v319_v62 = vstv %s826_s24  ;;  %s901_s17 = sld [smem:[#allocation2 + $0x25]]  ;;  %s903_s18 = sld [smem:[#allocation2 + $0x26]] }
  0x35   : > { %v323_v63 = vstv %s828_s25  ;;  %578 = vst.msk [vmem:[%s785_s7 + $0x30] sm:$0xff] %vm237_vm0, %v270_v56  ;;  %v287_v0 = vadd.f32 %v286_v50, %v283_v57  ;;  %v320_v1 = vmul.f32 %v847_v41, %v319_v62  ;;  %v327_v3 = vstv %s831_s26  ;;  %s913_s19 = sld [smem:[#allocation2 + $0x27]]  ;;  %s915_s20 = sld [smem:[#allocation2 + $0x28]] }
  0x36   : > { %v324_v2 = vmul.f32 %v850_v42, %v323_v63  ;;  %v308_v4 = vadd.f32 %v307_v58, %v304_v60  ;;  %v328_v5 = vmul.f32 %v856_v45, %v327_v3  ;;  %v333_v6 = vstv %s842_s27  ;;  %s922_s21 = sld [smem:[#allocation2 + $0x29]]  ;;  %s930_s22 = sld [smem:[#allocation2 + $0x2a]] }
  0x37   : > { %v336_v7 = vstv %s844_s28  ;;  %583 = vst.msk [vmem:[%s785_s7 + $0x48] sm:$0xff] %vm237_vm0, %v287_v0  ;;  %v321_v8 = vadd.f32 %v320_v1, %v317_v61  ;;  %v334_v9 = vmul.f32 %v840_v36, %v333_v6  ;;  %v340_v11 = vstv %s852_s29  ;;  %s932_s23 = sld [smem:[#allocation2 + $0x2b]]  ;;  %s936_s24 = sld [smem:[#allocation2 + $0x2c]] }
  0x38   : > { %v337_v10 = vmul.f32 %v847_v41, %v336_v7  ;;  %v312_v12 = vadd.f32 %v311_v59, %v308_v4  ;;  %v341_v13 = vmul.f32 %v850_v42, %v340_v11  ;;  %v344_v14 = vstv %s860_s30  ;;  %s942_s25 = sld [smem:[#allocation2 + $0x2d]]  ;;  %s944_s26 = sld [smem:[#allocation2 + $0x2e]] }
  0x39   : > { %v350_v15 = vstv %s862_s3  ;;  %v325_v16 = vadd.f32 %v324_v2, %v321_v8  ;;  %v345_v18 = vmul.f32 %v856_v45, %v344_v14  ;;  %v353_v23 = vstv %s868_s5  ;;  %s952_s4 = sld [smem:[#allocation2 + $0x2f]] }
  0x3a   : > { %v338_v17 = vadd.f32 %v337_v10, %v334_v9  ;;  %v351_v19 = vmul.f32 %v840_v36, %v350_v15  ;;  %592 = vst.msk [vmem:[%s785_s7 + $0x8] sm:$0xff] %vm237_vm0, %v312_v12  ;;  %v357_v24 = vstv %s870_s6  ;;  %v361_v25 = vstv %s876_s8 }
  0x3b   : > { %v375_v26 = vstv %s878_s9  ;;  %v329_v27 = vadd.f32 %v328_v5, %v325_v16  ;;  %v354_v29 = vmul.f32 %v847_v41, %v353_v23  ;;  %v358_v30 = vmul.f32 %v850_v42, %v357_v24 }
  0x3c   : > { %v342_v28 = vadd.f32 %v341_v13, %v338_v17  ;;  %v362_v31 = vmul.f32 %v856_v45, %v361_v25  ;;  %v376_v33 = vmul.f32 %v608_v20, %v375_v26  ;;  %v378_v34 = vstv %s885_s12 }
  0x3d   : > { %v382_v35 = vstv %s887_s14  ;;  %597 = vst.msk [vmem:[%s785_s7 + $0x20] sm:$0xff] %vm237_vm0, %v329_v27  ;;  %v355_v37 = vadd.f32 %v354_v29, %v351_v19  ;;  %v379_v38 = vmul.f32 %v609_v21, %v378_v34  ;;  %v386_v40 = vstv %s894_s15 }
  0x3e   : > { %v346_v36 = vadd.f32 %v345_v18, %v342_v28  ;;  %v383_v39 = vmul.f32 %v610_v22, %v382_v35  ;;  %v392_v41 = vstv %s896_s16  ;;  %v395_v42 = vstv %s901_s17 }
  0x3f   : > { %v399_v43 = vstv %s903_s18  ;;  %v359_v44 = vadd.f32 %v358_v30, %v355_v37  ;;  %v380_v45 = vadd.f32 %v379_v38, %v376_v33  ;;  %v387_v46 = vmul.f32 %v611_v32, %v386_v40 }
  0x40   : > { %602 = vst.msk [vmem:[%s785_s7 + $0x38] sm:$0xff] %vm237_vm0, %v346_v36  ;;  %v393_v47 = vmul.f32 %v608_v20, %v392_v41  ;;  %v396_v48 = vmul.f32 %v609_v21, %v395_v42  ;;  %v400_v49 = vmul.f32 %v610_v22, %v399_v43  ;;  %v403_v50 = vstv %s913_s19 }
  0x41   : > { %v409_v51 = vstv %s915_s20  ;;  %v363_v52 = vadd.f32 %v362_v31, %v359_v44  ;;  %v384_v53 = vadd.f32 %v383_v39, %v380_v45  ;;  %v404_v54 = vmul.f32 %v611_v32, %v403_v50 }
  0x42   : > { %v410_v55 = vmul.f32 %v608_v20, %v409_v51  ;;  %v397_v56 = vadd.f32 %v396_v48, %v393_v47  ;;  %v412_v57 = vstv %s922_s21  ;;  %v416_v58 = vstv %s930_s22 }
  0x43   : > { %v420_v59 = vstv %s932_s23  ;;  %607 = vst.msk [vmem:[%s785_s7 + $0x50] sm:$0xff] %vm237_vm0, %v363_v52  ;;  %v388_v60 = vadd.f32 %v387_v46, %v384_v53  ;;  %v413_v61 = vmul.f32 %v609_v21, %v412_v57  ;;  %v417_v62 = vmul.f32 %v610_v22, %v416_v58 }
  0x44   : > { %v421_v63 = vmul.f32 %v611_v32, %v420_v59  ;;  %v401_v0 = vadd.f32 %v400_v49, %v397_v56  ;;  %v426_v1 = vstv %s936_s24  ;;  %v429_v2 = vstv %s942_s25 }
  0x45   : > { %v433_v3 = vstv %s944_s26  ;;  %616 = vst.msk [vmem:[%s785_s7 + $0x10] sm:$0xff] %vm237_vm0, %v388_v60  ;;  %v414_v4 = vadd.f32 %v413_v61, %v410_v55  ;;  %v427_v5 = vmul.f32 %v608_v20, %v426_v1  ;;  %v430_v6 = vmul.f32 %v609_v21, %v429_v2 }
  0x46   : > { %v434_v7 = vmul.f32 %v610_v22, %v433_v3  ;;  %v405_v8 = vadd.f32 %v404_v54, %v401_v0  ;;  %v437_v9 = vstv %s952_s4 }
  0x47   : > { %v418_v10 = vadd.f32 %v417_v62, %v414_v4  ;;  %v431_v11 = vadd.f32 %v430_v6, %v427_v5  ;;  %v438_v12 = vmul.f32 %v611_v32, %v437_v9 }
  0x48   : > { %621 = vst.msk [vmem:[%s785_s7 + $0x28] sm:$0xff] %vm237_vm0, %v405_v8 }
  0x49   : > { %v422_v13 = vadd.f32 %v421_v63, %v418_v10  ;;  %v435_v14 = vadd.f32 %v434_v7, %v431_v11 }
  0x4b   : > { %626 = vst.msk [vmem:[%s785_s7 + $0x40] sm:$0xff] %vm237_vm0, %v422_v13  ;;  %v439_v15 = vadd.f32 %v438_v12, %v435_v14 }
  0x4d   : > { %631 = vst.msk [vmem:[%s785_s7 + $0x58] sm:$0xff] %vm237_vm0, %v439_v15 }
  0x4e PF: > { %s13_s11 = sadd.s32 1, %s711_s11   ;;  %s989_s9 = smov %s707_s10 }
  0x4f   : > { %p10_p2 = scmp.ge.s32.totalorder %s13_s11, 4   ;;  %s990_s10 = smov %s992_s13 }
  0x51   :  { %12 = sbr.rel (!%p10_p2) target bundleno = 2 (0x2), region = 85 }
  0x58   :  { %475 = vsyncpa [#allocation3], 1 }
  0x59   :  { %477 = vsyncpa [#allocation3 + $0x1], 1 }

</bundles_post_ra>
